<compile_context>
chip_gen: v6e
topology: v6e:2x2x1
jax: 0.10.0
libtpu: 0.0.40
codegen_flags: <defaults>
</compile_context>

<pallas_src>
import jax
import jax.numpy as jnp
from jax.experimental import pallas as pl
from jax.experimental.pallas import tpu as pltpu

LANE = 128      # vreg lane width (fast axis)
SUBLANE = 8     # f32 sublanes per vreg (slow axis)


def _map_add_kernel(x_ref, y_ref, o_ref):
    # torch semantics: map(add, x, y) + y == (x + y) + y, done in one HBM pass.
    # Two sequential adds keep bit-parity with PyTorch; extra VPU add is free.
    yv = y_ref[...]
    o_ref[...] = (x_ref[...] + yv) + yv


def map_model_forward(
    x,
    y,
    *,
    vmem_budget_bytes=32 * 1024 * 1024,  # budget for double-buffered x + out tiles
    max_tile_d=2048,                     # lane-axis tile cap (multiple of 128)
    force_pallas=False,
):
    """MapModel.forward.  x: (B, D) f32, y: (D,) f32 -> (B, D) f32."""
    B, D = x.shape
    y2 = y.reshape(1, D).astype(x.dtype)
    itemsize = x.dtype.itemsize

    # Tiny or lane-hostile shapes: fused XLA elementwise is strictly faster than
    # a pallas_call (per-step overhead, padded DMAs, masked vst for D < 128).
    if not force_pallas and (B * D * itemsize < 256 * 1024 or D < LANE):
        return (x + y2) + y2

    # --- Feature (lane) axis tiling: multiples of 128, evenly dividing D when
    # possible, so every block is lane-dense.
    if D % LANE == 0:
        tile_d = min(D, max_tile_d)
        while D % tile_d != 0:
            tile_d -= LANE
    else:
        tile_d = D  # full extent of a non-aligned axis is always layout-legal

    # --- Batch (sublane) axis tiling against the VMEM budget.
    # Peak resident ~= double-buffered x tile + double-buffered out tile:
    #   4 * tile_b * tile_d * itemsize   (+ a resident (1, tile_d) y tile).
    rows_budget = vmem_budget_bytes // (4 * tile_d * itemsize)
    tile_b = max(SUBLANE, (rows_budget // SUBLANE) * SUBLANE)
    tile_b = min(tile_b, B)   # full-extent block is always legal

    n_b = pl.cdiv(B, tile_b)
    n_d = pl.cdiv(D, tile_d)

    # Ensure >= 2 grid steps so dimension_semantics=("parallel", "parallel") can
    # actually feed both TensorCores on v7x (no-op on single-TC v5e/v6e).
    if n_b * n_d == 1 and B >= 2 * SUBLANE:
        tile_b = (((B + 1) // 2 + SUBLANE - 1) // SUBLANE) * SUBLANE
        n_b = pl.cdiv(B, tile_b)

    grid = (n_b, n_d)

    cost = pl.CostEstimate(
        flops=2 * B * D,
        transcendentals=0,
        bytes_accessed=(2 * B * D + D) * itemsize,
    )

    return pl.pallas_call(
        _map_add_kernel,
        out_shape=jax.ShapeDtypeStruct((B, D), x.dtype),
        grid_spec=pltpu.PrefetchScalarGridSpec(
            num_scalar_prefetch=0,
            grid=grid,
            in_specs=[
                pl.BlockSpec((tile_b, tile_d), lambda i, j: (i, j)),  # x tile
                pl.BlockSpec((1, tile_d), lambda i, j: (0, j)),       # y: resident across i
            ],
            out_specs=pl.BlockSpec((tile_b, tile_d), lambda i, j: (i, j)),
        ),
        compiler_params=pltpu.CompilerParams(
            dimension_semantics=("parallel", "parallel"),
            # 48 MiB: above the 16/32 MiB scoped defaults (v5e / v6e,v7x) so the
            # budget-sized tiles keep 2-deep pipelining, below v7x's 64 MiB VMEM.
            vmem_limit_bytes=48 * 1024 * 1024,
        ),
        cost_estimate=cost,
    )(x, y2)


def _reference(x, y):
    # Mirrors torch semantics exactly: map(add, x, y) over rows, then + y.
    y2 = y.reshape(1, -1).astype(x.dtype)
    return (x + y2) + y2


if __name__ == "__main__":
    key = jax.random.PRNGKey(0)
    k1, k2, k3, k4, k5, k6 = jax.random.split(key, 6)

    # 1) Module's canonical inputs (torch.randn(5, 3), torch.randn(3)):
    #    tiny / D<128 -> fused-XLA fallback path (same math, same rounding).
    x_small = jax.random.normal(k1, (5, 3), jnp.float32)
    y_small = jax.random.normal(k2, (3,), jnp.float32)
    out_small = jax.block_until_ready(map_model_forward(x_small, y_small))
    assert out_small.shape == (5, 3)
    assert jnp.allclose(out_small, _reference(x_small, y_small), atol=1e-6, rtol=1e-6)

    # 2) Pallas path: lane-dense D, batch split into 2 parallel tiles (grid (2,1)).
    x_a = jax.random.normal(k3, (512, 384), jnp.float32)
    y_a = jax.random.normal(k4, (384,), jnp.float32)
    out_a = jax.block_until_ready(map_model_forward(x_a, y_a))
    assert out_a.shape == (512, 384)
    assert jnp.allclose(out_a, _reference(x_a, y_a), atol=1e-6, rtol=1e-6)

    # 3) Pallas path exercising both grid axes: small VMEM budget + D tiling
    #    -> grid (4, 4) of full (128, 128) blocks.
    x_b = jax.random.normal(k5, (512, 512), jnp.float32)
    y_b = jax.random.normal(k6, (512,), jnp.float32)
    out_b = jax.block_until_ready(
        map_model_forward(x_b, y_b, vmem_budget_bytes=256 * 1024, max_tile_d=128)
    )
    assert out_b.shape == (512, 512)
    assert jnp.allclose(out_b, _reference(x_b, y_b), atol=1e-6, rtol=1e-6)

    print("KERNEL_OK")
</pallas_src>

<mosaic_0001>
module attributes {stable_mosaic.version = 11 : i64} {
  func.func @_map_add_kernel(%arg0: i32, %arg1: i32, %arg2: memref<256x384xf32, #tpu.memory_space<vmem>>, %arg3: memref<1x384xf32, #tpu.memory_space<vmem>>, %arg4: memref<256x384xf32, #tpu.memory_space<vmem>>) attributes {dimension_semantics = [#tpu.dimension_semantics<parallel>, #tpu.dimension_semantics<parallel>], iteration_bounds = array<i64: 2, 1>, scalar_prefetch = 0 : i64, scratch_operands = 0 : i64, tpu.core_type = #tpu.core_type<tc>, window_params = [{transform_indices = @transform_0, window_bounds = array<i64: 256, 384>}, {transform_indices = @transform_1, window_bounds = array<i64: 1, 384>}, {transform_indices = @transform_2, window_bounds = array<i64: 256, 384>}]} {
    %c0 = arith.constant 0 : index
    %c0_0 = arith.constant 0 : index
    %0 = vector.load %arg3[%c0, %c0_0] : memref<1x384xf32, #tpu.memory_space<vmem>>, vector<1x384xf32>
    %c0_1 = arith.constant 0 : index
    %c0_2 = arith.constant 0 : index
    %1 = vector.load %arg2[%c0_1, %c0_2] : memref<256x384xf32, #tpu.memory_space<vmem>>, vector<256x384xf32>
    %2 = vector.broadcast %0 : vector<1x384xf32> to vector<256x384xf32>
    %3 = arith.addf %1, %2 : vector<256x384xf32>
    %4 = vector.broadcast %0 : vector<1x384xf32> to vector<256x384xf32>
    %5 = arith.addf %3, %4 : vector<256x384xf32>
    %c0_3 = arith.constant 0 : index
    %c0_4 = arith.constant 0 : index
    %6 = vector.load %arg4[%c0_3, %c0_4] : memref<256x384xf32, #tpu.memory_space<vmem>>, vector<256x384xf32>
    tpu.vector_store %arg4[%c0_3, %c0_4], %5 {strides = array<i32>} : memref<256x384xf32, #tpu.memory_space<vmem>>, vector<256x384xf32>,
    return
  }
  func.func @transform_0(%arg0: i32, %arg1: i32) -> (i32, i32) {
    %c0_i32 = arith.constant 0 : i32
    return %arg0, %arg1 : i32, i32
  }
  func.func @transform_1(%arg0: i32, %arg1: i32) -> (i32, i32) {
    %c0_i32 = arith.constant 0 : i32
    %c0_i32_0 = arith.constant 0 : i32
    return %c0_i32, %arg1 : i32, i32
  }
  func.func @transform_2(%arg0: i32, %arg1: i32) -> (i32, i32) {
    %c0_i32 = arith.constant 0 : i32
    return %arg0, %arg1 : i32, i32
  }
}

</mosaic_0001>

<bundles_post_ra>
// kernel: tpu_custom_call.1
= control target key start
LH: loop header
LB: loop body
LE: loop exit
PB: predicated region body
PF: predicated region fallthrough
CT: control target
= control target key end

     0   :  { %7 = vsyncpa [#allocation3], 0  ;;  %s1564_s0 = inlined_call_operand.hbm [shape: f32[512,384], index: 0, kind: input, shape index: {}]   ;;  %s1565_s1 = inlined_call_operand.hbm [shape: f32[1,384], index: 1, kind: input, shape index: {}]   ;;  %s1566_s2 = inlined_call_operand.hbm [shape: f32[512,384], index: 2, kind: output, shape index: {}]  }
   0x1   :  { %9 = vsyncpa [#allocation3 + $0x1], 0 }
   0x2   :  { %10 = vsyncpa [#allocation6], 0 }
   0x3   :  { %11 = vsyncpa [#allocation4], 0 }
   0x4   :  { %13 = vsyncpa [#allocation4 + $0x1], 0  ;;  %s982_s9 = smov 0   ;;  %s984_s10 = smov 0  }
   0x5   :  { %s986_s11 = smov 0   ;;  %s988_s12 = smov 0  }
   0x6   :  { %s990_s13 = smov 0   ;;  %s992_s14 = smov 0  }
   0x7 LB: > { %s724_s15 = sadd.s32 4294967295, %s958_s14   ;;  %s725_s16 = sadd.s32 4294967294, %s958_s14   ;;  %s958_s14 = sphi %s992_s14, %s19_s14   ;;  %s954_s13 = sphi %s990_s13, %s1584_s13   ;;  %s950_s12 = sphi %s988_s12, %s1583_s12   ;;  %s946_s11 = sphi %s986_s11, %s1582_s11   ;;  %s942_s10 = sphi %s984_s10, %s1581_s10   ;;  %s938_s9 = sphi %s982_s9, %s1580_s9  }
   0x8   : > { %s40_s17 = sadd.s32 1, %s946_s11  ;;  %p47_p0 = scmp.ne.s32.totalorder %s946_s11, %s942_s10 }
   0x9   : > { %p48_p1 = scmp.eq.s32.totalorder %s958_s14, 0  ;;  %p53_p2 = scmp.ne.s32.totalorder %s942_s10, %s938_s9 }
   0xa   : > { %p1020_p3 = scmp.eq.s32.totalorder %s724_s15, 0  ;;  %p105_p4 = scmp.eq.s32.totalorder %s724_s15, 1 }
   0xb   : > { %p1024_p5 = por %p48_p1, %p47_p0  ;;  %p111_p6 = scmp.eq.s32.totalorder %s725_s16, 1 }
   0xc   : > { %p1030_p7 = por %p1020_p3, %p53_p2  ;;  %p1034_p8 = por %p105_p4, %p47_p0 }
   0xd   : > { %p1038_p9 = por %p111_p6, %p53_p2  ;;  %p726_p10 = scmp.ge.s32.totalorder %s958_s14, 1 }
   0xe   : > { %s1571_s21 = scalar_select %p1034_p8, 1, 0 }
   0xf   : > { %s1572_s22 = scalar_select %p1038_p9, 1, 0 }
  0x10   : > { %p118_p11 = scmp.lt.s32.totalorder %s958_s14, 3  ;;  %s960_s24 = smov [#allocation5]  }
  0x11   : > { %s134_s25 = sshll.u32 %s960_s24, 4  ;;  %p764_p1 = scmp.lt.s32.totalorder %s958_s14, 2  ;;  %s135_s25 = int_to_ptr.vmem [resolvable:$true] %s134_s25 }
  0x12   : > { %p1045_p13 = pnand %p726_p10, %p118_p11  ;;  %s31_s28 = sadd.s32 1, %s954_s13 }
  0x13   : > { %p1054_p4 = pnand %p764_p1, %p1024_p5  ;;  %p1065_p6 = scmp.ge.s32.totalorder %s31_s28, 2 }
  0x14   : > { %p751_p0 = pneg %p1045_p13  ;;  %s145_s30 = sand.u32 1, %s946_s11  }
  0x15   : > { %s831_s3 = scalar_lea.vmem %s135_s25, 48  ;;  %s838_s4 = scalar_lea.vmem %s135_s25, 64 }
  0x16   : > { %p1060_p2 = pnand %p751_p0, %p1020_p3  ;;  %p832_p11 = scmp.ne.s32.totalorder %s135_s25, %s831_s3 }
  0x17   : > { %p839_p12 = scmp.lt.s32.totalorder %s135_s25, %s135_s25  ;;  %p840_p9 = scmp.lt.s32.totalorder %s838_s4, %s831_s3 }
  0x18   : > { %p822_p10 = pneg %p1060_p2 }
  0x19   : > { %p841_p0 = por %p840_p9, %p839_p12 }
  0x1a   : > { %p834_p5 = pnand %p832_p11, %p822_p10 }
  0x1c   : > { %p835_p1 = pneg %p834_p5 }
  0x1e   : > { %p842_p8 = pnand %p841_p0, %p835_p1 }
  0x20   : > { %845 = shalt.err (!%p842_p8)
}
  0x21   : > { %754 = dma.hbm_to_vmem [thread:$0]  (!%p1060_p2), %s1565_s1, 48, %s135_s25, [#allocation6]  }
  0x22   : > { %s1586_s28 = smov (%p1065_p6, %s31_s28), 0  ;;  %s739_s7 = smul.u32 768, %s145_s30 }
  0x23   : > { %s35_s8 = ssub.s32 %s954_s13, %s1586_s28  ;;  %s740_s15 = smul.u32 12288, %s954_s13 }
  0x24   : > { %p38_p8 = scmp.eq.s32.totalorder %s35_s8, 0  ;;  %s149_s27 = scalar_lea.vmem [#allocation2], %s739_s7 }
  0x25   : > { %s158_s24 = scalar_lea.hbm %s1564_s0, %s740_s15  ;;  %s159_s3 = sshll.u32 %s149_s27, 4  ;;  %s160_s3 = int_to_ptr.vmem [resolvable:$true] %s159_s3 }
  0x26   : > { %s1090_s4 = scalar_select %p38_p8, %s946_s11, %s40_s17  }
  0x27   : > { %s146_s5 = scalar_lea.sflag [#allocation3], %s145_s30  ;;  %p848_p9 = pneg %p1054_p4 }
  0x28   : > { %s859_s25 = scalar_lea.vmem %s160_s3, 12288  ;;  %s961_s29 = smov [#allocation2]  }
  0x29   : > { %p860_p12 = scmp.ne.s32.totalorder %s160_s3, %s859_s25  ;;  %s864_s6 = sshll.u32 %s961_s29, 4  ;;  %s865_s6 = int_to_ptr.vmem [resolvable:$false] %s864_s6 }
  0x2a   : > { %s866_s8 = scalar_lea.vmem %s865_s6, 24576  ;;  %p867_p10 = scmp.lt.s32.totalorder %s160_s3, %s865_s6 }
  0x2b   : > { %p862_p2 = pnand %p860_p12, %p848_p9  ;;  %p868_p11 = scmp.lt.s32.totalorder %s866_s8, %s859_s25 }
  0x2d   : > { %p863_p6 = pneg %p862_p2  ;;  %p869_p5 = por %p868_p11, %p867_p10 }
  0x2f   : > { %p870_p1 = pnand %p869_p5, %p863_p6 }
  0x31   : > { %873 = shalt.err (!%p870_p1)
}
  0x32   : > { %s962_s7 = smov 384   ;;  %s963_s17 = smov 24  }
  0x33   : > { %758 = dma.hbm_to_vmem [thread:$0]  (!%p1054_p4), %s158_s24, 12288, %s160_s3, %s146_s5, %s962_s7, %s962_s7, %s963_s17  }
  0x34   : > { %171 = sbr.rel (%p1045_p13) target bundleno = 143 (0x8f), region = 28  ;;  %s1099_s30 = sand.u32 (!%p1045_p13), 1, %s942_s10  }
  0x35   : > { %s741_s15 = smul.u32 (!%p1045_p13), 768, %s1099_s30  ;;  %s174_s16 = scalar_lea.sflag (!%p1045_p13), [#allocation3], %s1099_s30 }
  0x37   : > { %s1105_s19 = scalar_lea.vmem (!%p1045_p13), [#allocation2], %s741_s15 }
  0x39   : > { %925 = dma.done.wait (%p1030_p7), %s174_s16, 12288  }
  0x3a   : > { %927 = vsyncadd (%p1030_p7), %s174_s16, 4294955008 }
  0x3b   : > { %929 = dma.done.wait (%p1020_p3), [#allocation6], 48  }
  0x3c   : > { %931 = vsyncadd (%p1020_p3), [#allocation6], 4294967248  ;;  %v305_v0 = vlaneseq  ;;  %v207_v5 = vld [vmem:[#allocation5] sm:$0x7]  ;;  %v209_v7 = vld [vmem:[%s1105_s19 + $0x8] sm:$0xff]  ;;  %s1155_s18 = scalar_lea.vmem [#allocation7], %s741_s15 }
  0x3d   : > { %v208_v6 = vld [vmem:[%s1105_s19] sm:$0xff]  ;;  %v210_v10 = vld [vmem:[%s1105_s19 + $0x10] sm:$0xff]  ;;  %v211_v12 = vld [vmem:[%s1105_s19 + $0x18] sm:$0xff]  ;;  %s742_s20 = smul.u32 12288, %s950_s12  ;;  %s625_s23 = sshll.u32 %s1155_s18, 4  ;;  %s1499_s23 = int_to_ptr.vmem [resolvable:$true] %s625_s23 }
  0x3e   : > { %v306_v1 = vshrl.u32 %v305_v0, 7  ;;  %v212_v13 = vld [vmem:[%s1105_s19 + $0x20] sm:$0xff]  ;;  %v213_v14 = vld [vmem:[%s1105_s19 + $0x28] sm:$0xff]  ;;  %v214_v15 = vld [vmem:[%s1105_s19 + $0x30] sm:$0xff]  ;;  %s609_s27 = scalar_lea.sflag [#allocation4], %s1099_s30  ;;  %s874_s3 = scalar_lea.vmem %s1499_s23, 12288 }
  0x3f   : > { %v215_v16 = vld [vmem:[%s1105_s19 + $0x38] sm:$0xff]  ;;  %v216_v21 = vld [vmem:[%s1105_s19 + $0x40] sm:$0xff]  ;;  %v217_v22 = vld [vmem:[%s1105_s19 + $0x48] sm:$0xff]  ;;  %s1508_s24 = scalar_lea.hbm %s1566_s2, %s742_s20  ;;  %p875_p3 = scmp.ne.s32.totalorder %s1499_s23, %s874_s3 }
  0x40   : > { %v307_v2 = vsub.s32 0, %v306_v1  ;;  %v311_v3 = vsub.s32 1, %v306_v1  ;;  %v315_v4 = vsub.s32 2, %v306_v1  ;;  %v218_v27 = vld [vmem:[%s1105_s19 + $0x50] sm:$0xff]  ;;  %v219_v28 = vld [vmem:[%s1105_s19 + $0x58] sm:$0xff]  ;;  %v220_v29 = vld [vmem:[%s1105_s19 + $0x60] sm:$0xff] }
  0x41   : > { %v221_v34 = vld [vmem:[%s1105_s19 + $0x68] sm:$0xff]  ;;  %v222_v35 = vld [vmem:[%s1105_s19 + $0x70] sm:$0xff]  ;;  %v223_v36 = vld [vmem:[%s1105_s19 + $0x78] sm:$0xff]  ;;  %p1577_p7 = scmp.ne.s32.totalorder %s1571_s21, 0  ;;  %s964_s5 = smov [#allocation7]  }
  0x42   : > { %v1117_v8 = vrot.slane %v207_v5, %v307_v2  ;;  %v1119_v9 = vrot.slane %v207_v5, %v311_v3  ;;  %v1122_v11 = vrot.slane %v207_v5, %v315_v4  ;;  %v224_v45 = vld [vmem:[%s1105_s19 + $0x80] sm:$0xff]  ;;  %v225_v46 = vld [vmem:[%s1105_s19 + $0x88] sm:$0xff]  ;;  %v226_v51 = vld [vmem:[%s1105_s19 + $0x90] sm:$0xff]  ;;  %s878_s25 = sshll.u32 %s964_s5, 4  ;;  %s879_s25 = int_to_ptr.vmem [resolvable:$false] %s878_s25 }
  0x43   : > { %v227_v52 = vld [vmem:[%s1105_s19 + $0x98] sm:$0xff]  ;;  %v228_v53 = vld [vmem:[%s1105_s19 + $0xa0] sm:$0xff]  ;;  %v229_v58 = vld [vmem:[%s1105_s19 + $0xa8] sm:$0xff]  ;;  %p876_p13 = pnand %p875_p3, %p1577_p7  ;;  %s880_s29 = scalar_lea.vmem %s879_s25, 24576 }
  0x44   : > { %v320_v17 = vadd.f32 %v1117_v8, %v208_v6  ;;  %v321_v18 = vadd.f32 %v1119_v9, %v209_v7  ;;  %v322_v19 = vadd.f32 %v1122_v11, %v210_v10  ;;  %v323_v20 = vadd.f32 %v1117_v8, %v211_v12  ;;  %v230_v59 = vld [vmem:[%s1105_s19 + $0xb0] sm:$0xff]  ;;  %v231_v60 = vld [vmem:[%s1105_s19 + $0xb8] sm:$0xff]  ;;  %v232_v5 = vld [vmem:[%s1105_s19 + $0xc0] sm:$0xff]  ;;  %p881_p0 = scmp.lt.s32.totalorder %s1499_s23, %s879_s25  ;;  %p882_p8 = scmp.lt.s32.totalorder %s880_s29, %s874_s3 }
  0x45   : > { %v324_v23 = vadd.f32 %v1119_v9, %v212_v13  ;;  %v325_v24 = vadd.f32 %v1122_v11, %v213_v14  ;;  %v326_v25 = vadd.f32 %v1117_v8, %v214_v15  ;;  %v327_v26 = vadd.f32 %v1119_v9, %v215_v16  ;;  %v233_v6 = vld [vmem:[%s1105_s19 + $0xc8] sm:$0xff]  ;;  %v234_v14 = vld [vmem:[%s1105_s19 + $0xd0] sm:$0xff]  ;;  %v235_v15 = vld [vmem:[%s1105_s19 + $0xd8] sm:$0xff]  ;;  %p877_p4 = pneg %p876_p13 }
  0x46   : > { %v416_v30 = vadd.f32 %v320_v17, %v1117_v8  ;;  %v417_v31 = vadd.f32 %v321_v18, %v1119_v9  ;;  %v418_v32 = vadd.f32 %v322_v19, %v1122_v11  ;;  %v419_v33 = vadd.f32 %v323_v20, %v1117_v8  ;;  %v236_v16 = vld [vmem:[%s1105_s19 + $0xe0] sm:$0xff]  ;;  %p883_p9 = por %p882_p8, %p881_p0 }
  0x47   : > { %v420_v37 = vadd.f32 %v324_v23, %v1119_v9  ;;  %v421_v38 = vadd.f32 %v325_v24, %v1122_v11  ;;  %v422_v39 = vadd.f32 %v326_v25, %v1117_v8  ;;  %v423_v40 = vadd.f32 %v327_v26, %v1119_v9  ;;  %v239_v23 = vld [vmem:[%s1105_s19 + $0xf8] sm:$0xff] }
  0x48   : > { %512 = vst [vmem:[%s1155_s18] sm:$0xff] %v416_v30  ;;  %513 = vst [vmem:[%s1155_s18 + $0x8] sm:$0xff] %v417_v31  ;;  %v328_v41 = vadd.f32 %v1122_v11, %v216_v21  ;;  %v329_v42 = vadd.f32 %v1117_v8, %v217_v22  ;;  %v330_v43 = vadd.f32 %v1119_v9, %v218_v27  ;;  %v237_v21 = vld [vmem:[%s1105_s19 + $0xe8] sm:$0xff]  ;;  %v238_v22 = vld [vmem:[%s1105_s19 + $0xf0] sm:$0xff]  ;;  %p884_p12 = pnand %p883_p9, %p877_p4 }
  0x49   : > { %514 = vst [vmem:[%s1155_s18 + $0x10] sm:$0xff] %v418_v32  ;;  %515 = vst [vmem:[%s1155_s18 + $0x18] sm:$0xff] %v419_v33  ;;  %v331_v44 = vadd.f32 %v1122_v11, %v219_v28  ;;  %v332_v47 = vadd.f32 %v1117_v8, %v220_v29  ;;  %v333_v48 = vadd.f32 %v1119_v9, %v221_v34  ;;  %v240_v32 = vld [vmem:[%s1105_s19 + $0x100] sm:$0xff]  ;;  %v241_v33 = vld [vmem:[%s1105_s19 + $0x108] sm:$0xff] }
  0x4a   : > { %516 = vst [vmem:[%s1155_s18 + $0x20] sm:$0xff] %v420_v37  ;;  %517 = vst [vmem:[%s1155_s18 + $0x28] sm:$0xff] %v421_v38  ;;  %v334_v49 = vadd.f32 %v1122_v11, %v222_v35  ;;  %v335_v50 = vadd.f32 %v1117_v8, %v223_v36  ;;  %v424_v54 = vadd.f32 %v328_v41, %v1122_v11  ;;  %v242_v38 = vld [vmem:[%s1105_s19 + $0x110] sm:$0xff] }
  0x4b   : > { %518 = vst [vmem:[%s1155_s18 + $0x30] sm:$0xff] %v422_v39  ;;  %519 = vst [vmem:[%s1155_s18 + $0x38] sm:$0xff] %v423_v40  ;;  %v425_v55 = vadd.f32 %v329_v42, %v1117_v8  ;;  %v426_v56 = vadd.f32 %v330_v43, %v1119_v9  ;;  %v427_v57 = vadd.f32 %v331_v44, %v1122_v11  ;;  %v243_v39 = vld [vmem:[%s1105_s19 + $0x118] sm:$0xff]  ;;  %v244_v40 = vld [vmem:[%s1105_s19 + $0x120] sm:$0xff] }
  0x4c   : > { %v428_v61 = vadd.f32 %v332_v47, %v1117_v8  ;;  %v429_v62 = vadd.f32 %v333_v48, %v1119_v9  ;;  %v430_v63 = vadd.f32 %v334_v49, %v1122_v11  ;;  %v431_v0 = vadd.f32 %v335_v50, %v1117_v8  ;;  %520 = vst [vmem:[%s1155_s18 + $0x40] sm:$0xff] %v424_v54  ;;  %v247_v47 = vld [vmem:[%s1105_s19 + $0x138] sm:$0xff] }
  0x4d   : > { %521 = vst [vmem:[%s1155_s18 + $0x48] sm:$0xff] %v425_v55  ;;  %522 = vst [vmem:[%s1155_s18 + $0x50] sm:$0xff] %v426_v56  ;;  %v336_v1 = vadd.f32 %v1119_v9, %v224_v45  ;;  %v337_v2 = vadd.f32 %v1122_v11, %v225_v46  ;;  %v338_v3 = vadd.f32 %v1117_v8, %v226_v51  ;;  %v245_v45 = vld [vmem:[%s1105_s19 + $0x128] sm:$0xff]  ;;  %v246_v46 = vld [vmem:[%s1105_s19 + $0x130] sm:$0xff] }
  0x4e   : > { %523 = vst [vmem:[%s1155_s18 + $0x58] sm:$0xff] %v427_v57  ;;  %v339_v4 = vadd.f32 %v1119_v9, %v227_v52  ;;  %524 = vst [vmem:[%s1155_s18 + $0x60] sm:$0xff] %v428_v61  ;;  %v340_v7 = vadd.f32 %v1122_v11, %v228_v53  ;;  %v341_v10 = vadd.f32 %v1117_v8, %v229_v58  ;;  %v248_v56 = vld [vmem:[%s1105_s19 + $0x140] sm:$0xff]  ;;  %v249_v57 = vld [vmem:[%s1105_s19 + $0x148] sm:$0xff] }
  0x4f   : > { %525 = vst [vmem:[%s1155_s18 + $0x68] sm:$0xff] %v429_v62  ;;  %526 = vst [vmem:[%s1155_s18 + $0x70] sm:$0xff] %v430_v63  ;;  %v342_v12 = vadd.f32 %v1119_v9, %v230_v59  ;;  %v343_v13 = vadd.f32 %v1122_v11, %v231_v60  ;;  %v432_v17 = vadd.f32 %v336_v1, %v1119_v9  ;;  %v250_v62 = vld [vmem:[%s1105_s19 + $0x150] sm:$0xff]  ;;  %v251_v63 = vld [vmem:[%s1105_s19 + $0x158] sm:$0xff] }
  0x50   : > { %527 = vst [vmem:[%s1155_s18 + $0x78] sm:$0xff] %v431_v0  ;;  %v433_v18 = vadd.f32 %v337_v2, %v1122_v11  ;;  %v434_v19 = vadd.f32 %v338_v3, %v1117_v8  ;;  %v435_v20 = vadd.f32 %v339_v4, %v1119_v9  ;;  %v436_v24 = vadd.f32 %v340_v7, %v1122_v11  ;;  %v252_v0 = vld [vmem:[%s1105_s19 + $0x160] sm:$0xff]  ;;  %v255_v7 = vld [vmem:[%s1105_s19 + $0x178] sm:$0xff] }
  0x51   : > { %v437_v25 = vadd.f32 %v341_v10, %v1117_v8  ;;  %v438_v26 = vadd.f32 %v342_v12, %v1119_v9  ;;  %v439_v27 = vadd.f32 %v343_v13, %v1122_v11  ;;  %528 = vst [vmem:[%s1155_s18 + $0x80] sm:$0xff] %v432_v17  ;;  %v344_v28 = vadd.f32 %v1117_v8, %v232_v5  ;;  %v253_v5 = vld [vmem:[%s1105_s19 + $0x168] sm:$0xff] }
  0x52   : > { %529 = vst [vmem:[%s1155_s18 + $0x88] sm:$0xff] %v433_v18  ;;  %530 = vst [vmem:[%s1155_s18 + $0x90] sm:$0xff] %v434_v19  ;;  %v345_v29 = vadd.f32 %v1119_v9, %v233_v6  ;;  %v346_v30 = vadd.f32 %v1122_v11, %v234_v14  ;;  %v347_v31 = vadd.f32 %v1117_v8, %v235_v15  ;;  %v254_v6 = vld [vmem:[%s1105_s19 + $0x170] sm:$0xff]  ;;  %v256_v19 = vld [vmem:[%s1105_s19 + $0x180] sm:$0xff] }
  0x53   : > { %531 = vst [vmem:[%s1155_s18 + $0x98] sm:$0xff] %v435_v20  ;;  %532 = vst [vmem:[%s1155_s18 + $0xa0] sm:$0xff] %v436_v24  ;;  %v348_v34 = vadd.f32 %v1119_v9, %v236_v16  ;;  %v349_v35 = vadd.f32 %v1122_v11, %v237_v21  ;;  %v350_v36 = vadd.f32 %v1117_v8, %v238_v22  ;;  %v257_v20 = vld [vmem:[%s1105_s19 + $0x188] sm:$0xff] }
  0x54   : > { %533 = vst [vmem:[%s1155_s18 + $0xa8] sm:$0xff] %v437_v25  ;;  %534 = vst [vmem:[%s1155_s18 + $0xb0] sm:$0xff] %v438_v26  ;;  %v351_v37 = vadd.f32 %v1119_v9, %v239_v23  ;;  %v440_v41 = vadd.f32 %v344_v28, %v1117_v8  ;;  %v441_v42 = vadd.f32 %v345_v29, %v1119_v9  ;;  %v258_v25 = vld [vmem:[%s1105_s19 + $0x190] sm:$0xff]  ;;  %v259_v26 = vld [vmem:[%s1105_s19 + $0x198] sm:$0xff] }
  0x55   : > { %535 = vst [vmem:[%s1155_s18 + $0xb8] sm:$0xff] %v439_v27  ;;  %v442_v43 = vadd.f32 %v346_v30, %v1122_v11  ;;  %v443_v44 = vadd.f32 %v347_v31, %v1117_v8  ;;  %v444_v48 = vadd.f32 %v348_v34, %v1119_v9  ;;  %v445_v49 = vadd.f32 %v349_v35, %v1122_v11  ;;  %v260_v27 = vld [vmem:[%s1105_s19 + $0x1a0] sm:$0xff]  ;;  %v263_v34 = vld [vmem:[%s1105_s19 + $0x1b8] sm:$0xff] }
  0x56   : > { %v446_v50 = vadd.f32 %v350_v36, %v1117_v8  ;;  %v447_v51 = vadd.f32 %v351_v37, %v1119_v9  ;;  %536 = vst [vmem:[%s1155_s18 + $0xc0] sm:$0xff] %v440_v41  ;;  %537 = vst [vmem:[%s1155_s18 + $0xc8] sm:$0xff] %v441_v42  ;;  %v352_v52 = vadd.f32 %v1122_v11, %v240_v32  ;;  %v261_v32 = vld [vmem:[%s1105_s19 + $0x1a8] sm:$0xff] }
  0x57   : > { %538 = vst [vmem:[%s1155_s18 + $0xd0] sm:$0xff] %v442_v43  ;;  %539 = vst [vmem:[%s1155_s18 + $0xd8] sm:$0xff] %v443_v44  ;;  %v353_v53 = vadd.f32 %v1117_v8, %v241_v33  ;;  %v354_v54 = vadd.f32 %v1119_v9, %v242_v38  ;;  %v355_v55 = vadd.f32 %v1122_v11, %v243_v39  ;;  %v262_v33 = vld [vmem:[%s1105_s19 + $0x1b0] sm:$0xff]  ;;  %v264_v43 = vld [vmem:[%s1105_s19 + $0x1c0] sm:$0xff] }
  0x58   : > { %540 = vst [vmem:[%s1155_s18 + $0xe0] sm:$0xff] %v444_v48  ;;  %541 = vst [vmem:[%s1155_s18 + $0xe8] sm:$0xff] %v445_v49  ;;  %v356_v58 = vadd.f32 %v1117_v8, %v244_v40  ;;  %v357_v59 = vadd.f32 %v1119_v9, %v245_v45  ;;  %v358_v60 = vadd.f32 %v1122_v11, %v246_v46  ;;  %v265_v44 = vld [vmem:[%s1105_s19 + $0x1c8] sm:$0xff]  ;;  %v266_v49 = vld [vmem:[%s1105_s19 + $0x1d0] sm:$0xff] }
  0x59   : > { %542 = vst [vmem:[%s1155_s18 + $0xf0] sm:$0xff] %v446_v50  ;;  %543 = vst [vmem:[%s1155_s18 + $0xf8] sm:$0xff] %v447_v51  ;;  %v359_v61 = vadd.f32 %v1117_v8, %v247_v47  ;;  %v448_v1 = vadd.f32 %v352_v52, %v1122_v11  ;;  %v449_v2 = vadd.f32 %v353_v53, %v1117_v8  ;;  %v267_v50 = vld [vmem:[%s1105_s19 + $0x1d8] sm:$0xff]  ;;  %v268_v51 = vld [vmem:[%s1105_s19 + $0x1e0] sm:$0xff] }
  0x5a   : > { %v450_v3 = vadd.f32 %v354_v54, %v1119_v9  ;;  %v451_v4 = vadd.f32 %v355_v55, %v1122_v11  ;;  %v452_v10 = vadd.f32 %v356_v58, %v1117_v8  ;;  %v453_v12 = vadd.f32 %v357_v59, %v1119_v9  ;;  %v271_v58 = vld [vmem:[%s1105_s19 + $0x1f8] sm:$0xff] }
  0x5b   : > { %v454_v13 = vadd.f32 %v358_v60, %v1122_v11  ;;  %v455_v14 = vadd.f32 %v359_v61, %v1117_v8  ;;  %544 = vst [vmem:[%s1155_s18 + $0x100] sm:$0xff] %v448_v1  ;;  %545 = vst [vmem:[%s1155_s18 + $0x108] sm:$0xff] %v449_v2  ;;  %v360_v15 = vadd.f32 %v1119_v9, %v248_v56  ;;  %v269_v56 = vld [vmem:[%s1105_s19 + $0x1e8] sm:$0xff] }
  0x5c   : > { %546 = vst [vmem:[%s1155_s18 + $0x110] sm:$0xff] %v450_v3  ;;  %547 = vst [vmem:[%s1155_s18 + $0x118] sm:$0xff] %v451_v4  ;;  %v361_v16 = vadd.f32 %v1122_v11, %v249_v57  ;;  %v362_v17 = vadd.f32 %v1117_v8, %v250_v62  ;;  %v363_v18 = vadd.f32 %v1119_v9, %v251_v63  ;;  %v270_v57 = vld [vmem:[%s1105_s19 + $0x1f0] sm:$0xff]  ;;  %v272_v3 = vld [vmem:[%s1105_s19 + $0x200] sm:$0xff] }
  0x5d   : > { %548 = vst [vmem:[%s1155_s18 + $0x120] sm:$0xff] %v452_v10  ;;  %549 = vst [vmem:[%s1155_s18 + $0x128] sm:$0xff] %v453_v12  ;;  %v364_v21 = vadd.f32 %v1122_v11, %v252_v0  ;;  %v365_v22 = vadd.f32 %v1117_v8, %v253_v5  ;;  %v366_v23 = vadd.f32 %v1119_v9, %v254_v6  ;;  %v273_v4 = vld [vmem:[%s1105_s19 + $0x208] sm:$0xff]  ;;  %v274_v12 = vld [vmem:[%s1105_s19 + $0x210] sm:$0xff] }
  0x5e   : > { %550 = vst [vmem:[%s1155_s18 + $0x130] sm:$0xff] %v454_v13  ;;  %551 = vst [vmem:[%s1155_s18 + $0x138] sm:$0xff] %v455_v14  ;;  %v367_v24 = vadd.f32 %v1122_v11, %v255_v7  ;;  %v456_v28 = vadd.f32 %v360_v15, %v1119_v9  ;;  %v457_v29 = vadd.f32 %v361_v16, %v1122_v11  ;;  %v275_v13 = vld [vmem:[%s1105_s19 + $0x218] sm:$0xff]  ;;  %v276_v14 = vld [vmem:[%s1105_s19 + $0x220] sm:$0xff] }
  0x5f   : > { %v458_v30 = vadd.f32 %v362_v17, %v1117_v8  ;;  %v459_v31 = vadd.f32 %v363_v18, %v1119_v9  ;;  %v460_v35 = vadd.f32 %v364_v21, %v1122_v11  ;;  %v461_v36 = vadd.f32 %v365_v22, %v1117_v8  ;;  %v279_v21 = vld [vmem:[%s1105_s19 + $0x238] sm:$0xff] }
  0x60   : > { %v462_v37 = vadd.f32 %v366_v23, %v1119_v9  ;;  %v463_v38 = vadd.f32 %v367_v24, %v1122_v11  ;;  %552 = vst [vmem:[%s1155_s18 + $0x140] sm:$0xff] %v456_v28  ;;  %553 = vst [vmem:[%s1155_s18 + $0x148] sm:$0xff] %v457_v29  ;;  %v368_v39 = vadd.f32 %v1117_v8, %v256_v19  ;;  %v277_v19 = vld [vmem:[%s1105_s19 + $0x228] sm:$0xff] }
  0x61   : > { %554 = vst [vmem:[%s1155_s18 + $0x150] sm:$0xff] %v458_v30  ;;  %555 = vst [vmem:[%s1155_s18 + $0x158] sm:$0xff] %v459_v31  ;;  %v369_v40 = vadd.f32 %v1119_v9, %v257_v20  ;;  %v370_v41 = vadd.f32 %v1122_v11, %v258_v25  ;;  %v371_v42 = vadd.f32 %v1117_v8, %v259_v26  ;;  %v278_v20 = vld [vmem:[%s1105_s19 + $0x230] sm:$0xff]  ;;  %v280_v30 = vld [vmem:[%s1105_s19 + $0x240] sm:$0xff] }
  0x62   : > { %556 = vst [vmem:[%s1155_s18 + $0x160] sm:$0xff] %v460_v35  ;;  %557 = vst [vmem:[%s1155_s18 + $0x168] sm:$0xff] %v461_v36  ;;  %v372_v45 = vadd.f32 %v1119_v9, %v260_v27  ;;  %v373_v46 = vadd.f32 %v1122_v11, %v261_v32  ;;  %v374_v47 = vadd.f32 %v1117_v8, %v262_v33  ;;  %v281_v31 = vld [vmem:[%s1105_s19 + $0x248] sm:$0xff]  ;;  %v282_v36 = vld [vmem:[%s1105_s19 + $0x250] sm:$0xff] }
  0x63   : > { %558 = vst [vmem:[%s1155_s18 + $0x170] sm:$0xff] %v462_v37  ;;  %559 = vst [vmem:[%s1155_s18 + $0x178] sm:$0xff] %v463_v38  ;;  %v375_v48 = vadd.f32 %v1119_v9, %v263_v34  ;;  %v464_v52 = vadd.f32 %v368_v39, %v1117_v8  ;;  %v465_v53 = vadd.f32 %v369_v40, %v1119_v9  ;;  %v283_v37 = vld [vmem:[%s1105_s19 + $0x258] sm:$0xff]  ;;  %v284_v38 = vld [vmem:[%s1105_s19 + $0x260] sm:$0xff] }
  0x64   : > { %v466_v54 = vadd.f32 %v370_v41, %v1122_v11  ;;  %v467_v55 = vadd.f32 %v371_v42, %v1117_v8  ;;  %v468_v59 = vadd.f32 %v372_v45, %v1119_v9  ;;  %v469_v60 = vadd.f32 %v373_v46, %v1122_v11  ;;  %v287_v45 = vld [vmem:[%s1105_s19 + $0x278] sm:$0xff] }
  0x65   : > { %v470_v61 = vadd.f32 %v374_v47, %v1117_v8  ;;  %v471_v62 = vadd.f32 %v375_v48, %v1119_v9  ;;  %560 = vst [vmem:[%s1155_s18 + $0x180] sm:$0xff] %v464_v52  ;;  %561 = vst [vmem:[%s1155_s18 + $0x188] sm:$0xff] %v465_v53  ;;  %v376_v63 = vadd.f32 %v1122_v11, %v264_v43  ;;  %v285_v43 = vld [vmem:[%s1105_s19 + $0x268] sm:$0xff] }
  0x66   : > { %562 = vst [vmem:[%s1155_s18 + $0x190] sm:$0xff] %v466_v54  ;;  %563 = vst [vmem:[%s1155_s18 + $0x198] sm:$0xff] %v467_v55  ;;  %v377_v0 = vadd.f32 %v1117_v8, %v265_v44  ;;  %v378_v1 = vadd.f32 %v1119_v9, %v266_v49  ;;  %v379_v2 = vadd.f32 %v1122_v11, %v267_v50  ;;  %v286_v44 = vld [vmem:[%s1105_s19 + $0x270] sm:$0xff]  ;;  %v288_v54 = vld [vmem:[%s1105_s19 + $0x280] sm:$0xff] }
  0x67   : > { %564 = vst [vmem:[%s1155_s18 + $0x1a0] sm:$0xff] %v468_v59  ;;  %565 = vst [vmem:[%s1155_s18 + $0x1a8] sm:$0xff] %v469_v60  ;;  %v380_v5 = vadd.f32 %v1117_v8, %v268_v51  ;;  %v381_v6 = vadd.f32 %v1119_v9, %v269_v56  ;;  %v382_v7 = vadd.f32 %v1122_v11, %v270_v57  ;;  %v289_v55 = vld [vmem:[%s1105_s19 + $0x288] sm:$0xff]  ;;  %v290_v60 = vld [vmem:[%s1105_s19 + $0x290] sm:$0xff] }
  0x68   : > { %566 = vst [vmem:[%s1155_s18 + $0x1b0] sm:$0xff] %v470_v61  ;;  %567 = vst [vmem:[%s1155_s18 + $0x1b8] sm:$0xff] %v471_v62  ;;  %v383_v10 = vadd.f32 %v1117_v8, %v271_v58  ;;  %v472_v15 = vadd.f32 %v376_v63, %v1122_v11  ;;  %v473_v16 = vadd.f32 %v377_v0, %v1117_v8  ;;  %v291_v61 = vld [vmem:[%s1105_s19 + $0x298] sm:$0xff]  ;;  %v292_v62 = vld [vmem:[%s1105_s19 + $0x2a0] sm:$0xff] }
  0x69   : > { %v474_v17 = vadd.f32 %v378_v1, %v1119_v9  ;;  %v475_v18 = vadd.f32 %v379_v2, %v1122_v11  ;;  %v476_v22 = vadd.f32 %v380_v5, %v1117_v8  ;;  %v477_v23 = vadd.f32 %v381_v6, %v1119_v9  ;;  %v295_v5 = vld [vmem:[%s1105_s19 + $0x2b8] sm:$0xff] }
  0x6a   : > { %v478_v24 = vadd.f32 %v382_v7, %v1122_v11  ;;  %v479_v25 = vadd.f32 %v383_v10, %v1117_v8  ;;  %568 = vst [vmem:[%s1155_s18 + $0x1c0] sm:$0xff] %v472_v15  ;;  %569 = vst [vmem:[%s1155_s18 + $0x1c8] sm:$0xff] %v473_v16  ;;  %v384_v26 = vadd.f32 %v1119_v9, %v272_v3  ;;  %v293_v3 = vld [vmem:[%s1105_s19 + $0x2a8] sm:$0xff] }
  0x6b   : > { %570 = vst [vmem:[%s1155_s18 + $0x1d0] sm:$0xff] %v474_v17  ;;  %571 = vst [vmem:[%s1155_s18 + $0x1d8] sm:$0xff] %v475_v18  ;;  %v385_v27 = vadd.f32 %v1122_v11, %v273_v4  ;;  %v386_v28 = vadd.f32 %v1117_v8, %v274_v12  ;;  %v387_v29 = vadd.f32 %v1119_v9, %v275_v13  ;;  %v294_v4 = vld [vmem:[%s1105_s19 + $0x2b0] sm:$0xff]  ;;  %v296_v17 = vld [vmem:[%s1105_s19 + $0x2c0] sm:$0xff] }
  0x6c   : > { %572 = vst [vmem:[%s1155_s18 + $0x1e0] sm:$0xff] %v476_v22  ;;  %573 = vst [vmem:[%s1155_s18 + $0x1e8] sm:$0xff] %v477_v23  ;;  %v388_v32 = vadd.f32 %v1122_v11, %v276_v14  ;;  %v389_v33 = vadd.f32 %v1117_v8, %v277_v19  ;;  %v390_v34 = vadd.f32 %v1119_v9, %v278_v20  ;;  %v297_v18 = vld [vmem:[%s1105_s19 + $0x2c8] sm:$0xff]  ;;  %v298_v23 = vld [vmem:[%s1105_s19 + $0x2d0] sm:$0xff] }
  0x6d   : > { %574 = vst [vmem:[%s1155_s18 + $0x1f0] sm:$0xff] %v478_v24  ;;  %575 = vst [vmem:[%s1155_s18 + $0x1f8] sm:$0xff] %v479_v25  ;;  %v391_v35 = vadd.f32 %v1122_v11, %v279_v21  ;;  %v480_v39 = vadd.f32 %v384_v26, %v1119_v9  ;;  %v481_v40 = vadd.f32 %v385_v27, %v1122_v11  ;;  %v299_v24 = vld [vmem:[%s1105_s19 + $0x2d8] sm:$0xff]  ;;  %v300_v25 = vld [vmem:[%s1105_s19 + $0x2e0] sm:$0xff] }
  0x6e   : > { %v482_v41 = vadd.f32 %v386_v28, %v1117_v8  ;;  %v483_v42 = vadd.f32 %v387_v29, %v1119_v9  ;;  %v484_v46 = vadd.f32 %v388_v32, %v1122_v11  ;;  %v485_v47 = vadd.f32 %v389_v33, %v1117_v8  ;;  %v303_v32 = vld [vmem:[%s1105_s19 + $0x2f8] sm:$0xff] }
  0x6f   : > { %v486_v48 = vadd.f32 %v390_v34, %v1119_v9  ;;  %v487_v49 = vadd.f32 %v391_v35, %v1122_v11  ;;  %576 = vst [vmem:[%s1155_s18 + $0x200] sm:$0xff] %v480_v39  ;;  %577 = vst [vmem:[%s1155_s18 + $0x208] sm:$0xff] %v481_v40  ;;  %v392_v50 = vadd.f32 %v1117_v8, %v280_v30  ;;  %v301_v30 = vld [vmem:[%s1105_s19 + $0x2e8] sm:$0xff] }
  0x70   : > { %578 = vst [vmem:[%s1155_s18 + $0x210] sm:$0xff] %v482_v41  ;;  %579 = vst [vmem:[%s1155_s18 + $0x218] sm:$0xff] %v483_v42  ;;  %v393_v51 = vadd.f32 %v1119_v9, %v281_v31  ;;  %v394_v52 = vadd.f32 %v1122_v11, %v282_v36  ;;  %v395_v53 = vadd.f32 %v1117_v8, %v283_v37  ;;  %v302_v31 = vld [vmem:[%s1105_s19 + $0x2f0] sm:$0xff] }
  0x71   : > { %580 = vst [vmem:[%s1155_s18 + $0x220] sm:$0xff] %v484_v46  ;;  %581 = vst [vmem:[%s1155_s18 + $0x228] sm:$0xff] %v485_v47  ;;  %v396_v56 = vadd.f32 %v1119_v9, %v284_v38  ;;  %v397_v57 = vadd.f32 %v1122_v11, %v285_v43  ;;  %v398_v58 = vadd.f32 %v1117_v8, %v286_v44 }
  0x72   : > { %582 = vst [vmem:[%s1155_s18 + $0x230] sm:$0xff] %v486_v48  ;;  %583 = vst [vmem:[%s1155_s18 + $0x238] sm:$0xff] %v487_v49  ;;  %v399_v59 = vadd.f32 %v1119_v9, %v287_v45  ;;  %v488_v63 = vadd.f32 %v392_v50, %v1117_v8  ;;  %v489_v0 = vadd.f32 %v393_v51, %v1119_v9 }
  0x73   : > { %v490_v1 = vadd.f32 %v394_v52, %v1122_v11  ;;  %v491_v2 = vadd.f32 %v395_v53, %v1117_v8  ;;  %v492_v6 = vadd.f32 %v396_v56, %v1119_v9  ;;  %v493_v7 = vadd.f32 %v397_v57, %v1122_v11 }
  0x74   : > { %v494_v10 = vadd.f32 %v398_v58, %v1117_v8  ;;  %v495_v12 = vadd.f32 %v399_v59, %v1119_v9  ;;  %584 = vst [vmem:[%s1155_s18 + $0x240] sm:$0xff] %v488_v63  ;;  %585 = vst [vmem:[%s1155_s18 + $0x248] sm:$0xff] %v489_v0  ;;  %v400_v13 = vadd.f32 %v1122_v11, %v288_v54 }
  0x75   : > { %586 = vst [vmem:[%s1155_s18 + $0x250] sm:$0xff] %v490_v1  ;;  %587 = vst [vmem:[%s1155_s18 + $0x258] sm:$0xff] %v491_v2  ;;  %v401_v14 = vadd.f32 %v1117_v8, %v289_v55  ;;  %v402_v15 = vadd.f32 %v1119_v9, %v290_v60  ;;  %v403_v16 = vadd.f32 %v1122_v11, %v291_v61 }
  0x76   : > { %588 = vst [vmem:[%s1155_s18 + $0x260] sm:$0xff] %v492_v6  ;;  %589 = vst [vmem:[%s1155_s18 + $0x268] sm:$0xff] %v493_v7  ;;  %v404_v19 = vadd.f32 %v1117_v8, %v292_v62  ;;  %v405_v20 = vadd.f32 %v1119_v9, %v293_v3  ;;  %v406_v21 = vadd.f32 %v1122_v11, %v294_v4 }
  0x77   : > { %590 = vst [vmem:[%s1155_s18 + $0x270] sm:$0xff] %v494_v10  ;;  %591 = vst [vmem:[%s1155_s18 + $0x278] sm:$0xff] %v495_v12  ;;  %v407_v22 = vadd.f32 %v1117_v8, %v295_v5  ;;  %v496_v26 = vadd.f32 %v400_v13, %v1122_v11  ;;  %v497_v27 = vadd.f32 %v401_v14, %v1117_v8 }
  0x78   : > { %v498_v28 = vadd.f32 %v402_v15, %v1119_v9  ;;  %v499_v29 = vadd.f32 %v403_v16, %v1122_v11  ;;  %v500_v33 = vadd.f32 %v404_v19, %v1117_v8  ;;  %v501_v34 = vadd.f32 %v405_v20, %v1119_v9 }
  0x79   : > { %v502_v35 = vadd.f32 %v406_v21, %v1122_v11  ;;  %v503_v36 = vadd.f32 %v407_v22, %v1117_v8  ;;  %592 = vst [vmem:[%s1155_s18 + $0x280] sm:$0xff] %v496_v26  ;;  %593 = vst [vmem:[%s1155_s18 + $0x288] sm:$0xff] %v497_v27  ;;  %v408_v37 = vadd.f32 %v1119_v9, %v296_v17 }
  0x7a   : > { %594 = vst [vmem:[%s1155_s18 + $0x290] sm:$0xff] %v498_v28  ;;  %595 = vst [vmem:[%s1155_s18 + $0x298] sm:$0xff] %v499_v29  ;;  %v409_v38 = vadd.f32 %v1122_v11, %v297_v18  ;;  %v410_v39 = vadd.f32 %v1117_v8, %v298_v23  ;;  %v411_v40 = vadd.f32 %v1119_v9, %v299_v24 }
  0x7b   : > { %596 = vst [vmem:[%s1155_s18 + $0x2a0] sm:$0xff] %v500_v33  ;;  %597 = vst [vmem:[%s1155_s18 + $0x2a8] sm:$0xff] %v501_v34  ;;  %v412_v41 = vadd.f32 %v1122_v11, %v300_v25  ;;  %v413_v42 = vadd.f32 %v1117_v8, %v301_v30  ;;  %v414_v43 = vadd.f32 %v1119_v9, %v302_v31 }
  0x7c   : > { %598 = vst [vmem:[%s1155_s18 + $0x2b0] sm:$0xff] %v502_v35  ;;  %599 = vst [vmem:[%s1155_s18 + $0x2b8] sm:$0xff] %v503_v36  ;;  %v415_v44 = vadd.f32 %v1122_v11, %v303_v32  ;;  %v504_v45 = vadd.f32 %v408_v37, %v1119_v9  ;;  %v505_v46 = vadd.f32 %v409_v38, %v1122_v11 }
  0x7d   : > { %v506_v47 = vadd.f32 %v410_v39, %v1117_v8  ;;  %v507_v48 = vadd.f32 %v411_v40, %v1119_v9  ;;  %v508_v49 = vadd.f32 %v412_v41, %v1122_v11  ;;  %v509_v50 = vadd.f32 %v413_v42, %v1117_v8 }
  0x7e   : > { %v510_v51 = vadd.f32 %v414_v43, %v1119_v9  ;;  %v511_v52 = vadd.f32 %v415_v44, %v1122_v11  ;;  %600 = vst [vmem:[%s1155_s18 + $0x2c0] sm:$0xff] %v504_v45  ;;  %601 = vst [vmem:[%s1155_s18 + $0x2c8] sm:$0xff] %v505_v46 }
  0x7f   : > { %602 = vst [vmem:[%s1155_s18 + $0x2d0] sm:$0xff] %v506_v47  ;;  %603 = vst [vmem:[%s1155_s18 + $0x2d8] sm:$0xff] %v507_v48 }
  0x80   : > { %604 = vst [vmem:[%s1155_s18 + $0x2e0] sm:$0xff] %v508_v49  ;;  %605 = vst [vmem:[%s1155_s18 + $0x2e8] sm:$0xff] %v509_v50 }
  0x81   : > { %606 = vst [vmem:[%s1155_s18 + $0x2f0] sm:$0xff] %v510_v51  ;;  %607 = vst [vmem:[%s1155_s18 + $0x2f8] sm:$0xff] %v511_v52 }
  0x82   : > { %887 = shalt.err (!%p884_p12)
}
  0x83   : > { %s888_s6 = scalar_lea.hbm %s1508_s24, 12288  ;;  %s892_s17 = scalar_lea.hbm %s1566_s2, 24576 }
  0x84   : > { %p889_p2 = scmp.ne.s32.totalorder %s1508_s24, %s888_s6  ;;  %p893_p11 = scmp.lt.s32.totalorder %s1508_s24, %s1566_s2 }
  0x85   : > { %p894_p5 = scmp.lt.s32.totalorder %s892_s17, %s888_s6 }
  0x86   : > { %p890_p6 = pnand %p889_p2, %p1577_p7 }
  0x87   : > { %p895_p1 = por %p894_p5, %p893_p11 }
  0x88   : > { %p891_p10 = pneg %p890_p6 }
  0x8a   : > { %p896_p3 = pnand %p895_p1, %p891_p10 }
  0x8c   : > { %899 = shalt.err (!%p896_p3)
}
  0x8d   : > { %s965_s19 = smov 384   ;;  %s966_s18 = smov 24  }
  0x8e   : > { %749 = dma.vmem_to_hbm [thread:$0]  (%p1577_p7), %s1499_s23, 12288, %s1508_s24, %s609_s27, %s965_s19, %s965_s19, %s966_s18  }
  0x8f PF: > { %s640_s20 = sand.u32 1, %s938_s9   ;;  %p1578_p13 = scmp.ne.s32.totalorder %s1572_s22, 0 }
  0x90   : > { %p1579_p4 = scmp.ge.s32.totalorder %s958_s14, 2  ;;  %s641_s12 = scalar_lea.sflag [#allocation4], %s640_s20 }
  0x92   : > { %p760_p0 = pnand %p1579_p4, %p1578_p13 }
  0x94   : > { %p761_p8 = pneg %p760_p0 }
  0x96   : > { %933 = dma.done.wait (%p761_p8), %s641_s12, 12288  }
  0x97   : > { %935 = vsyncadd (%p761_p8), %s641_s12, 4294955008  ;;  %s19_s14 = sadd.s32 1, %s958_s14   ;;  %s1580_s9 = smov %s942_s10 }
  0x98   : > { %p16_p9 = scmp.ge.s32.totalorder %s19_s14, 4   ;;  %s1581_s10 = smov %s946_s11 }
  0x99   : > { %s1582_s11 = smov %s1090_s4  ;;  %s1583_s12 = smov %s954_s13 }
  0x9a   : > { %s1584_s13 = smov %s1586_s28  ;;  %18 = sbr.rel (!%p16_p9) target bundleno = 7 (0x7), region = 78 }
  0x9f   :  { %646 = vsyncpa [#allocation3], 1 }
  0xa0   :  { %648 = vsyncpa [#allocation3 + $0x1], 1 }
  0xa1   :  { %649 = vsyncpa [#allocation6], 1 }
  0xa2   :  { %650 = vsyncpa [#allocation4], 1 }
  0xa3   :  { %652 = vsyncpa [#allocation4 + $0x1], 1 }

</bundles_post_ra>
